<compile_context>
chip_gen: v5e
topology: v5e:2x2
jax: 0.10.0
libtpu: 0.0.40
codegen_flags: <defaults>
</compile_context>

<pallas_src>
import math
import functools

import jax
import jax.numpy as jnp
from jax.experimental import pallas as pl
from jax.experimental.pallas import tpu as pltpu


# -----------------------------------------------------------------------------
# Per-generation budgets / tiles
# -----------------------------------------------------------------------------
def _vmem_limit_bytes():
    cap = 64 << 20  # conservative default (v7x physical VMEM)
    try:
        cap = int(getattr(pltpu.get_tpu_info(), "vmem_capacity_bytes", cap))
    except Exception:
        pass
    # 3/4 of capacity, capped at 96 MiB: ~48 MiB on v7x, 96 MiB on v5e/v6e.
    return int(min((cap * 3) // 4, 96 << 20))


_VMEM_LIMIT = _vmem_limit_bytes()


def _pick_tile(n, preferred):
    """Largest power-of-two tile <= preferred that divides n (>= 8), else n."""
    t = preferred
    while t > 8 and n % t:
        t //= 2
    if n % t:
        # TODO(synk): pad N / masked tail instead of a full-length tile for ragged N.
        return n
    return t


def _attn_tile_prefs():
    """(tq, tk) preferences per TPU generation."""
    kind = ""
    try:
        kind = jax.devices()[0].device_kind.lower()
    except Exception:
        pass
    if "v5 lite" in kind or "v5e" in kind:
        return 128, 512          # v5e: 128^2 MXU, amortize with bigger KV tiles
    return 256, 256              # v6e / v7x: 256^2 MXU


# -----------------------------------------------------------------------------
# Kernel 1: RMSNorm + QKV projection + RoPE (+ q scale), head-split outputs
#           grid = (B, seq-tiles)
# -----------------------------------------------------------------------------
def _rmsnorm_qkv_rope_kernel(x_ref, g_ref, w_ref, rope_ref,
                             q_ref, k_ref, v_ref, *,
                             heads, dim_head, rms_scale, q_scale):
    tm = x_ref.shape[1]
    hd = heads * dim_head
    half = dim_head // 2

    x = x_ref[0]                                              # (tm, D) f32
    # F.normalize(x, dim=-1) == x / max(||x||, 1e-12), via rsqrt (EUP slot).
    ssq = jnp.sum(x * x, axis=-1, keepdims=True)
    inv_norm = jax.lax.rsqrt(jnp.maximum(ssq, 1e-24))
    xn = (x * inv_norm) * rms_scale * g_ref[...]              # (tm, D) f32

    qkv = jnp.dot(xn.astype(jnp.bfloat16), w_ref[...],
                  preferred_element_type=jnp.float32)         # (tm, 3*hd) f32

    def split_heads(t):                                       # (tm, hd) -> (tm, H, Dh)
        return t.reshape(tm, heads, dim_head)

    cos = rope_ref[0][:, None, :]                             # (tm, 1, Dh)
    sin = rope_ref[1][:, None, :]

    def rope(t):                                              # rotate_half convention
        t1 = t[..., :half]
        t2 = t[..., half:]
        return t * cos + jnp.concatenate([-t2, t1], axis=-1) * sin

    q = rope(split_heads(qkv[:, :hd])) * q_scale              # pre-scale q here
    k = rope(split_heads(qkv[:, hd:2 * hd]))
    v = split_heads(qkv[:, 2 * hd:])

    # (tm, H, Dh) -> (H, tm, Dh): one transpose per tile so the attention kernel
    # gets a clean head-major layout with no per-head lane-offset slicing.
    q_ref[0] = jnp.transpose(q, (1, 0, 2)).astype(q_ref.dtype)
    k_ref[0] = jnp.transpose(k, (1, 0, 2)).astype(k_ref.dtype)
    v_ref[0] = jnp.transpose(v, (1, 0, 2)).astype(v_ref.dtype)


def rmsnorm_qkv_rope(x, gamma, w_qkv, rotary_emb, *, heads, dim_head):
    B, N, D = x.shape
    hd = heads * dim_head
    tm = _pick_tile(N, 256)

    # RoPE tables stored compactly as (2, N, Dh) f32: [cos, sin].
    if rotary_emb is None:
        rope = jnp.stack([jnp.ones((N, dim_head), jnp.float32),
                          jnp.zeros((N, dim_head), jnp.float32)], axis=0)
    else:
        rotary_emb = rotary_emb.astype(jnp.float32)
        rope = jnp.stack([jnp.cos(rotary_emb), jnp.sin(rotary_emb)], axis=0)

    kernel = functools.partial(_rmsnorm_qkv_rope_kernel,
                               heads=heads, dim_head=dim_head,
                               rms_scale=float(math.sqrt(D)),
                               q_scale=float(dim_head ** -0.5))

    qkv_out = jax.ShapeDtypeStruct((B, heads, N, dim_head), jnp.bfloat16)
    out_spec = pl.BlockSpec((1, heads, tm, dim_head), lambda b, n: (b, 0, n, 0))

    return pl.pallas_call(
        kernel,
        out_shape=(qkv_out, qkv_out, qkv_out),
        grid_spec=pltpu.PrefetchScalarGridSpec(
            num_scalar_prefetch=0,
            grid=(B, N // tm),
            in_specs=[
                pl.BlockSpec((1, tm, D), lambda b, n: (b, n, 0)),           # x tile
                pl.BlockSpec((1, D), lambda b, n: (0, 0)),                  # gamma
                pl.BlockSpec((D, 3 * hd), lambda b, n: (0, 0)),             # resident W_qkv
                pl.BlockSpec((2, tm, dim_head), lambda b, n: (0, n, 0)),    # rope [cos,sin]
            ],
            out_specs=[out_spec, out_spec, out_spec]),
        compiler_params=pltpu.CompilerParams(
            dimension_semantics=("parallel", "parallel"),
            vmem_limit_bytes=_VMEM_LIMIT),
    )(x, gamma, w_qkv, rope)


# -----------------------------------------------------------------------------
# Kernel 2: head-batched flash attention + fused output projection
#           grid = (B, q-tiles, kv-tiles); kv axis is the reduction axis.
# -----------------------------------------------------------------------------
def _flash_attn_outproj_kernel(q_ref, k_ref, v_ref, wo_ref, o_ref,
                               m_sc, l_sc, acc_sc):
    ki = pl.program_id(2)
    n_kv = pl.num_programs(2)

    @pl.when(ki == 0)
    def _init():
        m_sc[...] = jnp.full(m_sc.shape, -jnp.inf, dtype=jnp.float32)
        l_sc[...] = jnp.zeros_like(l_sc)
        acc_sc[...] = jnp.zeros_like(acc_sc)

    q = q_ref[0]                       # (H, tq, Dh) bf16  (roped, pre-scaled)
    k = k_ref[0]                       # (H, tk, Dh) bf16  (roped)
    v = v_ref[0]                       # (H, tk, Dh) bf16

    # Batched over heads: scores (H, tq, tk) in f32.
    s = jnp.einsum("hqd,hkd->hqk", q, k, preferred_element_type=jnp.float32)

    m_prev = m_sc[...]                                        # (H, tq, 1)
    m_new = jnp.maximum(m_prev, jnp.max(s, axis=-1, keepdims=True))
    alpha = jnp.exp(m_prev - m_new)
    p = jnp.exp(s - m_new)                                    # (H, tq, tk) f32
    l_sc[...] = alpha * l_sc[...] + jnp.sum(p, axis=-1, keepdims=True)
    pv = jnp.einsum("hqk,hkd->hqd", p.astype(jnp.bfloat16), v,
                    preferred_element_type=jnp.float32)       # (H, tq, Dh)
    acc_sc[...] = alpha * acc_sc[...] + pv
    m_sc[...] = m_new

    @pl.when(ki == n_kv - 1)
    def _finalize():
        h, tq, dh = acc_sc.shape
        attn = acc_sc[...] / l_sc[...]                        # (H, tq, Dh) f32
        # merge heads lane-dense once per q tile, then a single well-shaped matmul
        attn = jnp.transpose(attn, (1, 0, 2)).reshape(tq, h * dh)
        o_ref[0] = jnp.dot(attn.astype(jnp.bfloat16), wo_ref[...],
                           preferred_element_type=jnp.float32).astype(o_ref.dtype)


def flash_attention_out_proj(q, k, v, w_out):
    B, H, N, Dh = q.shape
    hd = H * Dh
    D = w_out.shape[1]
    tq_pref, tk_pref = _attn_tile_prefs()
    tq = _pick_tile(N, tq_pref)
    tk = _pick_tile(N, tk_pref)

    q_spec = pl.BlockSpec((1, H, tq, Dh), lambda b, qi, ki: (b, 0, qi, 0))
    kv_spec = pl.BlockSpec((1, H, tk, Dh), lambda b, qi, ki: (b, 0, ki, 0))
    wo_spec = pl.BlockSpec((hd, D), lambda b, qi, ki: (0, 0))        # resident W_out

    return pl.pallas_call(
        _flash_attn_outproj_kernel,
        out_shape=jax.ShapeDtypeStruct((B, N, D), jnp.float32),
        grid_spec=pltpu.PrefetchScalarGridSpec(
            num_scalar_prefetch=0,
            grid=(B, N // tq, N // tk),
            in_specs=[q_spec, kv_spec, kv_spec, wo_spec],
            out_specs=pl.BlockSpec((1, tq, D), lambda b, qi, ki: (b, qi, 0)),
            scratch_shapes=[
                pltpu.VMEM((H, tq, 1), jnp.float32),   # running max
                pltpu.VMEM((H, tq, 1), jnp.float32),   # running denom
                pltpu.VMEM((H, tq, Dh), jnp.float32),  # PV accumulator
            ]),
        compiler_params=pltpu.CompilerParams(
            dimension_semantics=("parallel", "parallel", "arbitrary"),
            vmem_limit_bytes=_VMEM_LIMIT),
    )(q, k, v, w_out)


# -----------------------------------------------------------------------------
# Wrapper: full module forward
# -----------------------------------------------------------------------------
def attention_forward(x, params, rotary_emb, *, heads, dim_head):
    # TODO(synk): Attend's optional `mask` argument is not implemented (mask=None only).
    q, k, v = rmsnorm_qkv_rope(x, params["gamma"], params["w_qkv"], rotary_emb,
                               heads=heads, dim_head=dim_head)   # (B,H,N,Dh) bf16
    return flash_attention_out_proj(q, k, v, params["w_out"])    # (B,N,D) f32


def init_params(key, dim, heads, dim_head):
    dim_inner = heads * dim_head
    k1, k2 = jax.random.split(key)
    w_qkv = jax.random.normal(k1, (dim, dim_inner * 3), jnp.float32) / math.sqrt(dim)
    w_out = jax.random.normal(k2, (dim_inner, dim), jnp.float32) / math.sqrt(dim_inner)
    return {
        "gamma": jnp.ones((1, dim), jnp.float32),   # RMSNorm gamma (init = ones)
        # Linear weights stored as (in, out), i.e. PyTorch weight.T, cast to bf16
        "w_qkv": w_qkv.astype(jnp.bfloat16),
        "w_out": w_out.astype(jnp.bfloat16),
    }


def make_rotary_emb(seq_len, dim_head):
    # Half-split ("NeoX"-style) rotary angles, matching the spec's rotate_half
    # (x1, x2 = chunk(2); cat(-x2, x1)): angles = cat([freqs, freqs], -1).
    inv_freq = 1.0 / (10000.0 ** (jnp.arange(0, dim_head, 2, dtype=jnp.float32) / dim_head))
    t = jnp.arange(seq_len, dtype=jnp.float32)
    freqs = t[:, None] * inv_freq[None, :]
    return jnp.concatenate([freqs, freqs], axis=-1)            # (N, Dh)


# -----------------------------------------------------------------------------
# Pure-JAX reference (mirrors the PyTorch module) for a correctness check
# -----------------------------------------------------------------------------
def reference_forward(x, params, rotary_emb, *, heads, dim_head):
    D = x.shape[-1]
    gamma = params["gamma"].astype(jnp.float32)
    w_qkv = params["w_qkv"].astype(jnp.float32)
    w_out = params["w_out"].astype(jnp.float32)

    xn = x / jnp.maximum(jnp.linalg.norm(x, axis=-1, keepdims=True), 1e-12)
    xn = xn * math.sqrt(D) * gamma
    qkv = xn @ w_qkv
    q, k, v = jnp.split(qkv, 3, axis=-1)
    B, N, hd = q.shape

    def split_heads(t):
        return t.reshape(B, N, heads, dim_head).transpose(0, 2, 1, 3)

    q, k, v = split_heads(q), split_heads(k), split_heads(v)
    cos = jnp.cos(rotary_emb)
    sin = jnp.sin(rotary_emb)

    def rope(t):
        t1, t2 = jnp.split(t, 2, axis=-1)
        return t * cos + jnp.concatenate([-t2, t1], axis=-1) * sin

    q, k = rope(q), rope(k)
    scale = dim_head ** -0.5
    s = jnp.einsum("bhqd,bhkd->bhqk", q, k) * scale
    p = jax.nn.softmax(s, axis=-1)
    o = jnp.einsum("bhqk,bhkd->bhqd", p, v)
    o = o.transpose(0, 2, 1, 3).reshape(B, N, hd)
    return o @ w_out


if __name__ == "__main__":
    # Small, shape-consistent configuration
    B, N = 2, 8
    dim, heads, dim_head = 32, 4, 16

    key = jax.random.PRNGKey(0)
    kx, kp = jax.random.split(key)

    x = jax.random.normal(kx, (B, N, dim), dtype=jnp.float32)
    params = init_params(kp, dim, heads, dim_head)
    rotary_emb = make_rotary_emb(N, dim_head)

    out = attention_forward(x, params, rotary_emb, heads=heads, dim_head=dim_head)
    out = jax.block_until_ready(out)

    assert out.shape == (B, N, dim)
    assert bool(jnp.all(jnp.isfinite(out)))

    ref = reference_forward(x, params, rotary_emb, heads=heads, dim_head=dim_head)
    max_err = float(jnp.max(jnp.abs(out - ref)))
    assert max_err < 1e-1, f"max abs error vs reference: {max_err}"

    print("KERNEL_OK")
</pallas_src>

<mosaic_0001>
module attributes {stable_mosaic.version = 11 : i64} {
  func.func @_rmsnorm_qkv_rope_kernel(%arg0: i32, %arg1: i32, %arg2: memref<1x8x32xf32, #tpu.memory_space<vmem>>, %arg3: memref<1x32xf32, #tpu.memory_space<vmem>>, %arg4: memref<32x192xbf16, #tpu.memory_space<vmem>>, %arg5: memref<2x8x16xf32, #tpu.memory_space<vmem>>, %arg6: memref<1x4x8x16xbf16, #tpu.memory_space<vmem>>, %arg7: memref<1x4x8x16xbf16, #tpu.memory_space<vmem>>, %arg8: memref<1x4x8x16xbf16, #tpu.memory_space<vmem>>) attributes {dimension_semantics = [#tpu.dimension_semantics<parallel>, #tpu.dimension_semantics<parallel>], iteration_bounds = array<i64: 2, 1>, scalar_prefetch = 0 : i64, scratch_operands = 0 : i64, tpu.core_type = #tpu.core_type<tc>, window_params = [{transform_indices = @transform_0, window_bounds = array<i64: 1, 8, 32>}, {pipeline_mode = #tpu.pipeline_mode<synchronous>, transform_indices = @transform_1, window_bounds = array<i64: 1, 32>}, {pipeline_mode = #tpu.pipeline_mode<synchronous>, transform_indices = @transform_2, window_bounds = array<i64: 32, 192>}, {transform_indices = @transform_3, window_bounds = array<i64: 2, 8, 16>}, {transform_indices = @transform_4, window_bounds = array<i64: 1, 4, 8, 16>}, {transform_indices = @transform_5, window_bounds = array<i64: 1, 4, 8, 16>}, {transform_indices = @transform_6, window_bounds = array<i64: 1, 4, 8, 16>}]} {
    %c0 = arith.constant 0 : index
    %c0_0 = arith.constant 0 : index
    %c0_1 = arith.constant 0 : index
    %0 = vector.load %arg2[%c0, %c0_0, %c0_1] : memref<1x8x32xf32, #tpu.memory_space<vmem>>, vector<1x8x32xf32>
    %1 = vector.shape_cast %0 : vector<1x8x32xf32> to vector<8x32xf32>
    %2 = arith.mulf %1, %1 : vector<8x32xf32>
    %cst = arith.constant dense<0.000000e+00> : vector<8xf32>
    %3 = vector.multi_reduction <add>, %2, %cst [1] : vector<8x32xf32> to vector<8xf32>
    %4 = vector.shape_cast %3 : vector<8xf32> to vector<8x1xf32>
    %cst_2 = arith.constant 1.000000e-24 : f32
    %5 = vector.broadcast %cst_2 : f32 to vector<8x1xf32>
    %6 = arith.maximumf %4, %5 : vector<8x1xf32>
    %7 = math.rsqrt %6 : vector<8x1xf32>
    %8 = vector.broadcast %7 : vector<8x1xf32> to vector<8x32xf32>
    %9 = arith.mulf %1, %8 : vector<8x32xf32>
    %cst_3 = arith.constant 5.65685415 : f32
    %10 = vector.broadcast %cst_3 : f32 to vector<8x32xf32>
    %11 = arith.mulf %9, %10 : vector<8x32xf32>
    %c0_4 = arith.constant 0 : index
    %c0_5 = arith.constant 0 : index
    %12 = vector.load %arg3[%c0_4, %c0_5] : memref<1x32xf32, #tpu.memory_space<vmem>>, vector<1x32xf32>
    %13 = vector.broadcast %12 : vector<1x32xf32> to vector<8x32xf32>
    %14 = arith.mulf %11, %13 : vector<8x32xf32>
    %15 = arith.truncf %14 : vector<8x32xf32> to vector<8x32xbf16>
    %c0_6 = arith.constant 0 : index
    %c0_7 = arith.constant 0 : index
    %16 = vector.load %arg4[%c0_6, %c0_7] : memref<32x192xbf16, #tpu.memory_space<vmem>>, vector<32x192xbf16>
    %cst_8 = arith.constant dense<0.000000e+00> : vector<8x192xf32>
    %17 = tpu.matmul %15, %16, %cst_8 {dimension_numbers = #tpu.dot_dimension_numbers<[1], [0], [0], [1], [0, 0, 1, 1], [], []>} : vector<8x32xbf16>, vector<32x192xbf16>, vector<8x192xf32> -> vector<8x192xf32>
    %c0_9 = arith.constant 0 : index
    %c0_10 = arith.constant 0 : index
    %c0_11 = arith.constant 0 : index
    %18 = vector.load %arg5[%c0_9, %c0_10, %c0_11] : memref<2x8x16xf32, #tpu.memory_space<vmem>>, vector<1x8x16xf32>
    %19 = vector.shape_cast %18 : vector<1x8x16xf32> to vector<8x16xf32>
    %20 = vector.shape_cast %19 : vector<8x16xf32> to vector<8x1x16xf32>
    %c1 = arith.constant 1 : index
    %c0_12 = arith.constant 0 : index
    %c0_13 = arith.constant 0 : index
    %21 = vector.load %arg5[%c1, %c0_12, %c0_13] : memref<2x8x16xf32, #tpu.memory_space<vmem>>, vector<1x8x16xf32>
    %22 = vector.shape_cast %21 : vector<1x8x16xf32> to vector<8x16xf32>
    %23 = vector.shape_cast %22 : vector<8x16xf32> to vector<8x1x16xf32>
    %24 = vector.extract_strided_slice %17 {offsets = [0, 0], sizes = [8, 64], strides = [1, 1]} : vector<8x192xf32> to vector<8x64xf32>
    %25 = vector.shape_cast %24 : vector<8x64xf32> to vector<8x4x16xf32>
    %26 = vector.extract_strided_slice %25 {offsets = [0, 0, 0], sizes = [8, 4, 8], strides = [1, 1, 1]} : vector<8x4x16xf32> to vector<8x4x8xf32>
    %27 = vector.extract_strided_slice %25 {offsets = [0, 0, 8], sizes = [8, 4, 8], strides = [1, 1, 1]} : vector<8x4x16xf32> to vector<8x4x8xf32>
    %28 = vector.broadcast %20 : vector<8x1x16xf32> to vector<8x4x16xf32>
    %29 = arith.mulf %25, %28 : vector<8x4x16xf32>
    %cst_14 = arith.constant 0.000000e+00 : f32
    %30 = vector.broadcast %cst_14 : f32 to vector<8x4x8xf32>
    %31 = arith.subf %30, %27 : vector<8x4x8xf32>
    %32 = tpu.concatenate %31, %26 in 2 : vector<8x4x8xf32>, vector<8x4x8xf32> -> vector<8x4x16xf32>
    %33 = vector.broadcast %23 : vector<8x1x16xf32> to vector<8x4x16xf32>
    %34 = arith.mulf %32, %33 : vector<8x4x16xf32>
    %35 = arith.addf %29, %34 : vector<8x4x16xf32>
    %cst_15 = arith.constant 2.500000e-01 : f32
    %36 = vector.broadcast %cst_15 : f32 to vector<8x4x16xf32>
    %37 = arith.mulf %35, %36 : vector<8x4x16xf32>
    %38 = vector.extract_strided_slice %17 {offsets = [0, 64], sizes = [8, 64], strides = [1, 1]} : vector<8x192xf32> to vector<8x64xf32>
    %39 = vector.shape_cast %38 : vector<8x64xf32> to vector<8x4x16xf32>
    %40 = vector.extract_strided_slice %39 {offsets = [0, 0, 0], sizes = [8, 4, 8], strides = [1, 1, 1]} : vector<8x4x16xf32> to vector<8x4x8xf32>
    %41 = vector.extract_strided_slice %39 {offsets = [0, 0, 8], sizes = [8, 4, 8], strides = [1, 1, 1]} : vector<8x4x16xf32> to vector<8x4x8xf32>
    %42 = vector.broadcast %20 : vector<8x1x16xf32> to vector<8x4x16xf32>
    %43 = arith.mulf %39, %42 : vector<8x4x16xf32>
    %cst_16 = arith.constant 0.000000e+00 : f32
    %44 = vector.broadcast %cst_16 : f32 to vector<8x4x8xf32>
    %45 = arith.subf %44, %41 : vector<8x4x8xf32>
    %46 = tpu.concatenate %45, %40 in 2 : vector<8x4x8xf32>, vector<8x4x8xf32> -> vector<8x4x16xf32>
    %47 = vector.broadcast %23 : vector<8x1x16xf32> to vector<8x4x16xf32>
    %48 = arith.mulf %46, %47 : vector<8x4x16xf32>
    %49 = arith.addf %43, %48 : vector<8x4x16xf32>
    %50 = vector.extract_strided_slice %17 {offsets = [0, 128], sizes = [8, 64], strides = [1, 1]} : vector<8x192xf32> to vector<8x64xf32>
    %51 = vector.shape_cast %50 : vector<8x64xf32> to vector<8x4x16xf32>
    %52 = tpu.transpose %37, [1, 0, 2] : vector<8x4x16xf32> -> vector<4x8x16xf32>
    %53 = arith.truncf %52 : vector<4x8x16xf32> to vector<4x8x16xbf16>
    %c0_17 = arith.constant 0 : index
    %c0_18 = arith.constant 0 : index
    %c0_19 = arith.constant 0 : index
    %c0_20 = arith.constant 0 : index
    %54 = vector.load %arg6[%c0_17, %c0_18, %c0_19, %c0_20] : memref<1x4x8x16xbf16, #tpu.memory_space<vmem>>, vector<1x4x8x16xbf16>
    %55 = vector.shape_cast %54 : vector<1x4x8x16xbf16> to vector<4x8x16xbf16>
    %56 = vector.shape_cast %53 : vector<4x8x16xbf16> to vector<1x4x8x16xbf16>
    tpu.vector_store %arg6[%c0_17, %c0_18, %c0_19, %c0_20], %56 {strides = array<i32>} : memref<1x4x8x16xbf16, #tpu.memory_space<vmem>>, vector<1x4x8x16xbf16>,
    %57 = tpu.transpose %49, [1, 0, 2] : vector<8x4x16xf32> -> vector<4x8x16xf32>
    %58 = arith.truncf %57 : vector<4x8x16xf32> to vector<4x8x16xbf16>
    %c0_21 = arith.constant 0 : index
    %c0_22 = arith.constant 0 : index
    %c0_23 = arith.constant 0 : index
    %c0_24 = arith.constant 0 : index
    %59 = vector.load %arg7[%c0_21, %c0_22, %c0_23, %c0_24] : memref<1x4x8x16xbf16, #tpu.memory_space<vmem>>, vector<1x4x8x16xbf16>
    %60 = vector.shape_cast %59 : vector<1x4x8x16xbf16> to vector<4x8x16xbf16>
    %61 = vector.shape_cast %58 : vector<4x8x16xbf16> to vector<1x4x8x16xbf16>
    tpu.vector_store %arg7[%c0_21, %c0_22, %c0_23, %c0_24], %61 {strides = array<i32>} : memref<1x4x8x16xbf16, #tpu.memory_space<vmem>>, vector<1x4x8x16xbf16>,
    %62 = tpu.transpose %51, [1, 0, 2] : vector<8x4x16xf32> -> vector<4x8x16xf32>
    %63 = arith.truncf %62 : vector<4x8x16xf32> to vector<4x8x16xbf16>
    %c0_25 = arith.constant 0 : index
    %c0_26 = arith.constant 0 : index
    %c0_27 = arith.constant 0 : index
    %c0_28 = arith.constant 0 : index
    %64 = vector.load %arg8[%c0_25, %c0_26, %c0_27, %c0_28] : memref<1x4x8x16xbf16, #tpu.memory_space<vmem>>, vector<1x4x8x16xbf16>
    %65 = vector.shape_cast %64 : vector<1x4x8x16xbf16> to vector<4x8x16xbf16>
    %66 = vector.shape_cast %63 : vector<4x8x16xbf16> to vector<1x4x8x16xbf16>
    tpu.vector_store %arg8[%c0_25, %c0_26, %c0_27, %c0_28], %66 {strides = array<i32>} : memref<1x4x8x16xbf16, #tpu.memory_space<vmem>>, vector<1x4x8x16xbf16>,
    return
  }
  func.func @transform_0(%arg0: i32, %arg1: i32) -> (i32, i32, i32) {
    %c0_i32 = arith.constant 0 : i32
    %c0_i32_0 = arith.constant 0 : i32
    return %arg0, %arg1, %c0_i32 : i32, i32, i32
  }
  func.func @transform_1(%arg0: i32, %arg1: i32) -> (i32, i32) {
    %c0_i32 = arith.constant 0 : i32
    %c0_i32_0 = arith.constant 0 : i32
    %c0_i32_1 = arith.constant 0 : i32
    return %c0_i32, %c0_i32_0 : i32, i32
  }
  func.func @transform_2(%arg0: i32, %arg1: i32) -> (i32, i32) {
    %c0_i32 = arith.constant 0 : i32
    %c0_i32_0 = arith.constant 0 : i32
    %c0_i32_1 = arith.constant 0 : i32
    return %c0_i32, %c0_i32_0 : i32, i32
  }
  func.func @transform_3(%arg0: i32, %arg1: i32) -> (i32, i32, i32) {
    %c0_i32 = arith.constant 0 : i32
    %c0_i32_0 = arith.constant 0 : i32
    %c0_i32_1 = arith.constant 0 : i32
    return %c0_i32, %arg1, %c0_i32_0 : i32, i32, i32
  }
  func.func @transform_4(%arg0: i32, %arg1: i32) -> (i32, i32, i32, i32) {
    %c0_i32 = arith.constant 0 : i32
    %c0_i32_0 = arith.constant 0 : i32
    %c0_i32_1 = arith.constant 0 : i32
    return %arg0, %c0_i32, %arg1, %c0_i32_0 : i32, i32, i32, i32
  }
  func.func @transform_5(%arg0: i32, %arg1: i32) -> (i32, i32, i32, i32) {
    %c0_i32 = arith.constant 0 : i32
    %c0_i32_0 = arith.constant 0 : i32
    %c0_i32_1 = arith.constant 0 : i32
    return %arg0, %c0_i32, %arg1, %c0_i32_0 : i32, i32, i32, i32
  }
  func.func @transform_6(%arg0: i32, %arg1: i32) -> (i32, i32, i32, i32) {
    %c0_i32 = arith.constant 0 : i32
    %c0_i32_0 = arith.constant 0 : i32
    %c0_i32_1 = arith.constant 0 : i32
    return %arg0, %c0_i32, %arg1, %c0_i32_0 : i32, i32, i32, i32
  }
}

</mosaic_0001>

<bundles_post_ra>
// kernel: tpu_custom_call.1
= control target key start
LH: loop header
LB: loop body
LE: loop exit
PB: predicated region body
PF: predicated region fallthrough
CT: control target
= control target key end

     0   :  { %s2465_s0 = inlined_call_operand.hbm [shape: f32[2,8,32], index: 0, kind: input, shape index: {}]   ;;  %s2466_s1 = inlined_call_operand.hbm [shape: f32[1,32], index: 1, kind: input, shape index: {}]   ;;  %s2467_s2 = inlined_call_operand.hbm [shape: bf16[32,192], index: 2, kind: input, shape index: {}]   ;;  %s2468_s3 = inlined_call_operand.hbm [shape: f32[2,8,16], index: 3, kind: input, shape index: {}]   ;;  %s2469_s4 = inlined_call_operand.hbm [shape: bf16[2,4,8,16], index: 4, kind: output, shape index: {0}]   ;;  %s2470_s5 = inlined_call_operand.hbm [shape: bf16[2,4,8,16], index: 5, kind: output, shape index: {1}]   ;;  %s2471_s6 = inlined_call_operand.hbm [shape: bf16[2,4,8,16], index: 6, kind: output, shape index: {2}]  }
   0x1   :  { %2473 = sst [smem:[#allocation19_spill]] %s2466_s1 }
   0x2   :  { %2474 = sst [smem:[#allocation20_spill]] %s2467_s2 }
   0x3   :  { %12 = vsyncpa [#allocation3], 0 }
   0x4   :  { %14 = vsyncpa [#allocation3 + $0x1], 0 }
   0x5   :  { %15 = vsyncpa [#allocation6], 0 }
   0x6   :  { %16 = vsyncpa [#allocation9], 0 }
   0x7   :  { %17 = vsyncpa [#allocation4], 0 }
   0x8   :  { %19 = vsyncpa [#allocation4 + $0x1], 0 }
   0x9   :  { %20 = vsyncpa [#allocation12], 0 }
   0xa   :  { %22 = vsyncpa [#allocation12 + $0x1], 0  ;;  %s1838_s21 = smov 0   ;;  %s1840_s22 = smov 0  }
   0xb   :  { %s1842_s23 = smov 0   ;;  %s1844_s24 = smov 0  }
   0xc   :  { %s1846_s25 = smov 0   ;;  %s1848_s26 = smov 0  }
   0xd LB: > { %s1869_s27 = sadd.s32 4294967295, %s1787_s26   ;;  %s2472_s28 = sadd.s32 4294967294, %s1787_s26   ;;  %s1787_s26 = sphi %s1848_s26, %s28_s26   ;;  %s1783_s25 = sphi %s1846_s25, %s2488_s25   ;;  %s1779_s24 = sphi %s1844_s24, %s2487_s24   ;;  %s1775_s23 = sphi %s1842_s23, %s2486_s23   ;;  %s1771_s22 = sphi %s1840_s22, %s2485_s22   ;;  %s1767_s21 = sphi %s1838_s21, %s2484_s21  }
   0xe   : > { %p62_p0 = scmp.ne.s32.totalorder %s1771_s22, %s1767_s21  ;;  %p63_p1 = scmp.eq.s32.totalorder %s1869_s27, 0 }
   0xf   : > { %p156_p2 = scmp.eq.s32.totalorder %s1869_s27, 1  ;;  %p162_p3 = scmp.eq.s32.totalorder %s2472_s28, 1 }
  0x10   : > { %p1880_p4 = por %p63_p1, %p62_p0  ;;  %p1349_p5 = scmp.ge.s32.totalorder %s1787_s26, 1 }
  0x11   : > { %p1885_p6 = por %p162_p3, %p62_p0  ;;  %p225_p7 = scmp.lt.s32.totalorder %s1787_s26, 3 }
  0x12   : > { %s2477_s1 = sld [smem:[#allocation19_spill]]  ;;  %p1353_p9 = scmp.ge.s32.totalorder %s1787_s26, 2 }
  0x13   : > { %p1893_p8 = pnand %p1349_p5, %p225_p7  ;;  %s1789_s11 = smov [#allocation5]  }
  0x14   : > { %s239_s12 = sshll.u32 %s1789_s11, 4  ;;  %s2479_s2 = sld [smem:[#allocation20_spill]]  ;;  %s240_s12 = int_to_ptr.vmem [resolvable:$true] %s239_s12 }
  0x15   : > { %p1420_p10 = pneg %p1893_p8  ;;  %s1790_s17 = smov [#allocation7]  }
  0x16   : > { %s250_s18 = sshll.u32 %s1790_s17, 4  ;;  %s1791_s19 = smov 128   ;;  %s251_s18 = int_to_ptr.vmem [resolvable:$true] %s250_s18 }
  0x17   : > { %p1905_p11 = pnand %p1420_p10, %p63_p1  ;;  %s1792_s20 = smov 8  }
  0x18   : > { %s237_s9 = sshll.u32 %s2477_s1, 4  ;;  %s264_s11 = sshll.u32 %s2468_s3, 4  ;;  %s238_s9 = int_to_ptr.hbm [resolvable:$true] %s237_s9  ;;  %s265_s11 = int_to_ptr.hbm [resolvable:$true] %s264_s11 }
  0x19   : > { %1423 = dma.hbm_to_vmem [thread:$0]  (!%p1905_p11), %s238_s9, 16, %s240_s12, [#allocation6]  }
  0x1a   : > { %s248_s15 = sshll.u32 %s2479_s2, 4  ;;  %s1793_s13 = smov [#allocation8]   ;;  %s249_s15 = int_to_ptr.hbm [resolvable:$true] %s248_s15 }
  0x1b   : > { %1426 = dma.hbm_to_vmem [thread:$0]  (!%p1905_p11), %s249_s15, 512, %s251_s18, [#allocation6], %s1791_s19, %s1791_s19, %s1792_s20  }
  0x1c   : > { %s266_s14 = sshll.u32 %s1793_s13, 4  ;;  %s49_s9 = sadd.s32 1, %s1775_s23  ;;  %s267_s14 = int_to_ptr.vmem [resolvable:$true] %s266_s14 }
  0x1d   : > { %1429 = dma.hbm_to_vmem [thread:$0]  (!%p1905_p11), %s265_s11, 256, %s267_s14, [#allocation9], %s1791_s19, %s1791_s19, %s1792_s20  }
  0x1e   : > { %s40_s12 = sadd.s32 1, %s1783_s25  ;;  %p56_p12 = scmp.ne.s32.totalorder %s1775_s23, %s1771_s22 }
  0x1f   : > { %p42_p13 = scmp.ge.s32.totalorder %s40_s12, 2  ;;  %p57_p0 = scmp.eq.s32.totalorder %s1787_s26, 0 }
  0x20   : > { %p1925_p3 = por %p156_p2, %p56_p12  ;;  %p1447_p5 = scmp.lt.s32.totalorder %s1787_s26, 2 }
  0x21   : > { %s2490_s12 = smov (%p42_p13, %s40_s12), 0  ;;  %p1932_p7 = por %p57_p0, %p56_p12 }
  0x22   : > { %s280_s16 = sand.u32 1, %s1775_s23   ;;  %s44_s18 = ssub.s32 %s1783_s25, %s2490_s12 }
  0x23   : > { %p47_p10 = scmp.eq.s32.totalorder %s44_s18, 0  ;;  %s1354_s19 = sshll.u32 %s280_s16, 3 }
  0x24   : > { %s1355_s20 = sshll.u32 %s1783_s25, 3  ;;  %s284_s14 = scalar_lea.vmem [#allocation2], %s1354_s19 }
  0x25   : > { %s1941_s7 = scalar_select %p47_p10, %s1775_s23, %s49_s9  }
  0x26   : > { %s289_s13 = scalar_lea.hbm %s2465_s0, %s1355_s20  ;;  %s293_s28 = sshll.u32 %s284_s14, 4  ;;  %s294_s28 = int_to_ptr.vmem [resolvable:$true] %s293_s28 }
  0x27   : > { %s291_s1 = sshll.u32 %s289_s13, 4  ;;  %p1431_p2 = pnand %p1447_p5, %p1932_p7  ;;  %s292_s1 = int_to_ptr.hbm [resolvable:$true] %s291_s1 }
  0x28   : > { %s281_s2 = scalar_lea.sflag [#allocation3], %s280_s16  ;;  %302 = sbr.rel (%p1893_p8) target bundleno = 757 (0x2f5), region = 36 }
  0x29   : > { %1433 = dma.hbm_to_vmem [thread:$0]  (!%p1431_p2), %s292_s1, 128, %s294_s28, %s281_s2  }
  0x2a   : > { %s1953_s9 = sand.u32 (!%p1893_p8), 1, %s1771_s22  }
  0x2b   : > { %s1357_s18 = sshll.u32 (!%p1893_p8), %s1953_s9, 3  ;;  %s305_s19 = scalar_lea.sflag (!%p1893_p8), [#allocation3], %s1953_s9 }
  0x2c   : > { %s308_s20 = scalar_lea.vmem (!%p1893_p8), [#allocation2], %s1357_s18 }
  0x2d   : > { %1746 = dma.done.wait (%p1880_p4), %s305_s19, 128  }
  0x2e   : > { %1748 = vsyncadd (%p1880_p4), %s305_s19, 4294967168 }
  0x2f   : > { %1750 = dma.done.wait (%p63_p1), [#allocation6], 528  }
  0x30   : > { %1752 = vsyncadd (%p63_p1), [#allocation6], 4294966768 }
  0x31   : > { %1754 = dma.done.wait (%p63_p1), [#allocation9], 256  }
  0x32   : > { %1756 = vsyncadd (%p63_p1), [#allocation9], 4294967040  ;;  %v364_v0 = vld [vmem:[%s308_s20] sm:$0xff]  ;;  %vm366_vm0 = vcmask 261120   ;;  %v1366_v8 = vld [vmem:[#allocation7] sm:$0xf] }
  0x33   : > { %v365_v1 = vmul.f32 %v364_v0, %v364_v0  ;;  %v1374_v3 = vld [vmem:[#allocation7 + $0x10] sm:$0xf]  ;;  %v1396_v4 = vld [vmem:[#allocation7 + $0x14] sm:$0xf0]  ;;  %v1395_v5 = vld [vmem:[#allocation7 + $0x14] sm:$0xf] }
  0x34   : > { %v1375_v6 = vor.u32 %v1396_v4, %v1374_v3  ;;  %v1376_v7 = vld [vmem:[#allocation7 + $0x18] sm:$0xf0]  ;;  %v1394_v9 = vld [vmem:[#allocation7 + $0x4] sm:$0xf0]  ;;  %v1393_v11 = vld [vmem:[#allocation7 + $0x4] sm:$0xf] }
  0x35   : > { %v367_v2 = vsel %vm366_vm0, %v365_v1, 0.0  ;;  %v1379_v10 = vor.u32 %v1395_v5, %v1376_v7  ;;  %v1368_v12 = vld [vmem:[#allocation7 + $0x8] sm:$0xf0]  ;;  %v1367_v13 = vor.u32 %v1394_v9, %v1366_v8  ;;  %v1514_v25 = vld [vmem:[#allocation5] ss:$0 sm:$0xff]  ;;  %s1794_s1 = smov 64  }
  0x36   : > { %368 = vadd.xlane.f32.xlu0 %v367_v2  ;;  %422 = vmatpush.bf16.msra.mxu0 %v1375_v6  ;;  %v1371_v14 = vor.u32 %v1393_v11, %v1368_v12  ;;  %s1795_s2 = smov 112   ;;  %s1796_s28 = smov 96   ;;  %v1798_v34 = vmov 1983009808   ;;  %vm472_vm4 = vcmask 1047556   ;;  %vm971_vm5 = vcmask 125952  }
  0x37   : > { %435 = vmatpush.bf16.msra.mxu1 %v1379_v10  ;;  %s1797_s29 = smov 80   ;;  %v477_v35 = vunpack.c.l.s4 %v1798_v34  ;;  %v1799_v41 = vmov 1934713408   ;;  %s1800_s10 = smov 8   ;;  %vm624_vm6 = vcmask 64512  }
  0x38   : > { %v501_v42 = vunpack.c.l.s4 %v1799_v41  ;;  %s1801_s17 = smov 120   ;;  %s2067_s16 = sshll.u32 %s1953_s9, 4 }
  0x39   : > { %v1978_v40 = vunpack.c.0.s8 %v477_v35  ;;  %s2083_s8 = scalar_lea.vmem [#allocation13], %s2067_s16  ;;  %s2292_s11 = sshll.u32 %s1779_s24, 4 }
  0x3a   : > { %423 = vmatpush.bf16.msra.mxu0 %v1367_v13  ;;  %v1981_v49 = vunpack.c.0.s8 %v501_v42  ;;  %s1125_s18 = scalar_lea.hbm %s2469_s4, %s2292_s11  ;;  %s348_s24 = scalar_lea.vmem [#allocation10], %s2067_s16 }
  0x3b   : > { %436 = vmatpush.bf16.msra.mxu1 %v1371_v14  ;;  %s1126_s19 = sshll.u32 %s348_s24, 4  ;;  %s2306_s20 = sshll.u32 %s1125_s18, 4  ;;  %s1127_s19 = int_to_ptr.vmem [resolvable:$true] %s1126_s19  ;;  %s1129_s20 = int_to_ptr.hbm [resolvable:$true] %s2306_s20 }
  0x3c   : > { %s1657_s13 = scalar_lea.hbm %s2469_s4, 32 }
  0xa9   : > { %v369_v15 = vpop.xlane.xlu0 %368 }
  0xaa   : > { %v370_v16 = vmax.f32 %v369_v15, 1e-24 }
  0xac   : > { %1515 = vrsqrt.f32 %v370_v16  ;;  %vm377_vm2 = vweird.f32 %v370_v16 }
  0xb2   : > { %v1516_v17 = vpop.eup %1515 }
  0xb3   : > { %v372_v18 = vmul.f32 %v1516_v17, %v370_v16  ;;  %vm378_vm1 = vweird.f32 %v1516_v17 }
  0xb4   : > { %vm379_vm3 = vmor %vm377_vm2, %vm378_vm1 }
  0xb5   : > { %v373_v19 = vmul.f32 %v1516_v17, %v372_v18 }
  0xb7   : > { %v374_v20 = vmul.f32 0.5, %v373_v19 }
  0xb9   : > { %v375_v21 = vsub.f32 1.5, %v374_v20 }
  0xbb   : > { %v376_v22 = vmul.f32 %v1516_v17, %v375_v21 }
  0xbd   : > { %v380_v23 = vsel %vm379_vm3, %v1516_v17, %v376_v22 }
  0xbe   : > { %v381_v24 = vmul.f32 %v380_v23, %v364_v0 }
  0xc0   : > { %v382_v26 = vmul.f32 5.656854, %v381_v24 }
  0xc2   : > { %v387_v27 = vmul.f32 %v1514_v25, %v382_v26 }
  0xc4   : > { %v388_v28 = vpack.c.bf16 %v387_v27, %v387_v27 }
  0xc6   : > { %1380 = vmatmul.msk.bf16.vlgmr.msra.gmra.mxu0 %vm366_vm0, %v388_v28  ;;  %1381 = vmatmul.msk.bf16.vlgmr.msra.gmra.mxu1 %vm366_vm0, %v388_v28 }
 0x143   : > { %v425_v29 = vpop.f32.mrf.mxu0  ;;  %v438_v30 = vpop.f32.mrf.mxu1 }
 0x144   : > { %673 = vrot.lane.b32.xlu2 %v425_v29, %s1794_s1  ;;  %462 = vrot.lane.b32.xlu1 %v425_v29, %s1795_s2  ;;  %v474_v38 = vrot.slane %v425_v29, 4  ;;  %v857_v47 = vrot.slane %v438_v30, 4 }
 0x145   : > { %465 = vrot.lane.b32.xlu0 %v425_v29, %s1796_s28 }
 0x14b   : > { %v427_v31 = vpop.f32.mrf.mxu0  ;;  %v440_v32 = vpop.f32.mrf.mxu1 }
 0x14c   : > { %849 = vrot.lane.b32.xlu2 %v438_v30, %s1796_s28  ;;  %468 = vrot.lane.b32.xlu1 %v425_v29, %s1797_s29  ;;  %s1651_s28 = sshra.s32 %s1129_s20, 4  ;;  %s1652_s28 = int_to_ptr.hbm [resolvable:$true] %s1651_s28 }
 0x14d   : > { %846 = vrot.lane.b32.xlu0 %v438_v30, %s1795_s2  ;;  %s1103_s2 = scalar_lea.sflag [#allocation4], %s1953_s9  ;;  %p1658_p11 = scmp.lt.s32.totalorder %s1652_s28, %s2469_s4 }
 0x154   : > { %852 = vrot.lane.b32.xlu1 %v438_v30, %s1797_s29  ;;  %s1653_s29 = scalar_lea.hbm %s1652_s28, 16 }
 0x155   : > { %p1654_p1 = scmp.ne.s32.totalorder %s1652_s28, %s1653_s29  ;;  %p1659_p12 = scmp.lt.s32.totalorder %s1657_s13, %s1653_s29 }
 0x157   : > { %p1655_p4 = pnand %p1654_p1, %p1925_p3  ;;  %p1660_p13 = por %p1659_p12, %p1658_p11 }
 0x159   : > { %p1656_p8 = pneg %p1655_p4 }
 0x15b   : > { %p1661_p0 = pnand %p1660_p13, %p1656_p8 }
 0x19e   : > { %v1973_v33 = vpop.permute.xlu2 %673 }
 0x1a6   : > { %v850_v44 = vpop.permute.xlu2 %849 }
 0x1a7   : > { %v855_v50 = vrot.slane %v850_v44, 4  ;;  %v858_v56 = vsel %vm472_vm4, %v850_v44, %v857_v47 }
 0x1a8   : > { %v866_v0 = vperm.slane %v858_v56, %v1978_v40 }
 0x1a9   : > { %v856_v62 = vsel %vm472_vm4, %v855_v50, %v438_v30 }
 0x1aa   : > { %v862_v4 = vperm.slane %v856_v62, %v1978_v40  ;;  %v893_v12 = vrot.slane %v866_v0, 4 }
 0x1ac   : > { %v881_v16 = vrot.slane %v862_v4, 4 }
 0x1b6   : > { %v463_v36 = vpop.permute.xlu1 %462 }
 0x1b7   : > { %v466_v37 = vpop.permute.xlu0 %465  ;;  %675 = vrot.lane.b32.xlu2 %v463_v36, %s1794_s1  ;;  %v486_v46 = vrot.slane %v463_v36, 4 }
 0x1b8   : > { %677 = vrot.lane.b32.xlu1 %v466_v37, %s1794_s1  ;;  %v475_v39 = vsel %vm472_vm4, %v466_v37, %v474_v38  ;;  %v471_v43 = vrot.slane %v466_v37, 4 }
 0x1b9   : > { %v483_v45 = vperm.slane %v475_v39, %v1978_v40 }
 0x1ba   : > { %v473_v51 = vsel %vm472_vm4, %v471_v43, %v425_v29 }
 0x1bb   : > { %v510_v54 = vrot.slane %v483_v45, 4  ;;  %v479_v58 = vperm.slane %v473_v51, %v1978_v40 }
 0x1bd   : > { %v498_v5 = vrot.slane %v479_v58, 4 }
 0x1be   : > { %v469_v48 = vpop.permute.xlu1 %468 }
 0x1bf   : > { %v484_v52 = vrot.slane %v469_v48, 4  ;;  %v487_v53 = vsel %vm472_vm4, %v469_v48, %v486_v46  ;;  %v847_v60 = vpop.permute.xlu0 %846 }
 0x1c0   : > { %v495_v55 = vperm.slane %v487_v53, %v1978_v40  ;;  %679 = vrot.lane.b32.xlu1 %v469_v48, %s1794_s1  ;;  %v869_v2 = vrot.slane %v847_v60, 4 }
 0x1c1   : > { %v485_v57 = vsel %vm472_vm4, %v484_v52, %v463_v36 }
 0x1c2   : > { %v491_v59 = vperm.slane %v485_v57, %v1978_v40  ;;  %v511_v61 = vsel %vm472_vm4, %v495_v55, %v510_v54  ;;  %v508_v8 = vrot.slane %v495_v55, 4 }
 0x1c3   : > { %v1994_v63 = vperm.slane %v511_v61, %v1981_v49 }
 0x1c4   : > { %v496_v1 = vrot.slane %v491_v59, 4  ;;  %v499_v14 = vsel %vm472_vm4, %v491_v59, %v498_v5  ;;  %v509_v22 = vsel %vm472_vm4, %v508_v8, %v483_v45 }
 0x1c5   : > { %612 = vrot.lane.b32.xlu2 %v1994_v63, %s1800_s10  ;;  %v558_v3 = vsub.f32 0.0, %v1994_v63  ;;  %v2016_v21 = vperm.slane %v499_v14, %v1981_v49  ;;  %v526_v26 = vrot.slane %v1994_v63, 4  ;;  %v2028_v31 = vperm.slane %v509_v22, %v1981_v49 }
 0x1c6   : > { %v853_v6 = vpop.permute.xlu1 %852  ;;  %v497_v7 = vsel %vm472_vm4, %v496_v1, %v479_v58 }
 0x1c7   : > { %v867_v9 = vrot.slane %v853_v6, 4  ;;  %v870_v10 = vsel %vm472_vm4, %v853_v6, %v869_v2  ;;  %v2004_v11 = vperm.slane %v497_v7, %v1981_v49  ;;  %v2036_v39 = vsel %vm472_vm4, 0.0, %v526_v26 }
 0x1c8   : > { %v878_v13 = vperm.slane %v870_v10, %v1978_v40  ;;  %580 = vrot.lane.b32.xlu1 %v558_v3, %s1801_s17  ;;  %v554_v61 = vsub.f32 0.0, %v2016_v21  ;;  %v522_v62 = vrot.slane %v2016_v21, 4  ;;  %v524_v26 = vrot.slane %v2028_v31, 4 }
 0x1c9   : > { %v868_v15 = vsel %vm472_vm4, %v867_v9, %v847_v60  ;;  %600 = vrot.lane.b32.xlu0 %v2004_v11, %s1800_s10  ;;  %v520_v41 = vrot.slane %v2004_v11, 4  ;;  %v552_v53 = vsub.f32 0.0, %v2004_v11 }
 0x1ca   : > { %v874_v17 = vperm.slane %v868_v15, %v1978_v40  ;;  %v891_v18 = vrot.slane %v878_v13, 4  ;;  %v894_v19 = vsel %vm472_vm4, %v878_v13, %v893_v12  ;;  %v556_v13 = vsub.f32 0.0, %v2028_v31 }
 0x1cb   : > { %v902_v20 = vperm.slane %v894_v19, %v1981_v49  ;;  %v2055_v60 = vsel %vm472_vm4, 0.0, %v520_v41  ;;  %v2075_v14 = vsel %vm472_vm4, 0.0, %v522_v62 }
 0x1cc   : > { %v879_v23 = vrot.slane %v874_v17, 4  ;;  %v882_v24 = vsel %vm472_vm4, %v874_v17, %v881_v16  ;;  %v892_v25 = vsel %vm472_vm4, %v891_v18, %v866_v0 }
 0x1cd   : > { %v890_v27 = vperm.slane %v882_v24, %v1981_v49  ;;  %v898_v28 = vperm.slane %v892_v25, %v1981_v49  ;;  %v909_v29 = vrot.slane %v902_v20, 4  ;;  %604 = vrot.lane.b32.xlu2 %v2016_v21, %s1800_s10  ;;  %v559_v25 = vsub.f32 0.0, %v2036_v39 }
 0x1ce   : > { %v880_v30 = vsel %vm472_vm4, %v879_v23, %v862_v4  ;;  %v555_v23 = vsub.f32 0.0, %v2075_v14 }
 0x1cf   : > { %v886_v32 = vperm.slane %v880_v30, %v1981_v49  ;;  %v905_v34 = vrot.slane %v890_v27, 4  ;;  %v907_v35 = vrot.slane %v898_v28, 4  ;;  %v910_v36 = vsel %vm472_vm4, 0.0, %v909_v29 }
 0x1d0   : > { %v1051_v37 = vsel %vm472_vm4, %v909_v29, %v898_v28  ;;  %v1056_v38 = vrot.slane %v910_v36, 4  ;;  %608 = vrot.lane.b32.xlu1 %v2028_v31, %s1800_s10  ;;  %v2100_v27 = vsel %vm472_vm4, 0.0, %v524_v26  ;;  %v553_v28 = vsub.f32 0.0, %v2055_v60 }
 0x1d1   : > { %v903_v42 = vrot.slane %v886_v32, 4  ;;  %v906_v43 = vsel %vm472_vm4, 0.0, %v905_v34  ;;  %v908_v44 = vsel %vm472_vm4, 0.0, %v907_v35  ;;  %v1040_v45 = vsel %vm472_vm4, %v905_v34, %v886_v32  ;;  %614 = vrot.lane.b32.xlu0 %v2036_v39, %s1800_s10 }
 0x1d2   : > { %v1044_v46 = vperm.slane %v1040_v45, %v1978_v40  ;;  %v1045_v47 = vrot.slane %v906_v43, 4  ;;  %v1055_v48 = vperm.slane %v1051_v37, %v1978_v40  ;;  %v1057_v50 = vsel %vm472_vm4, %v1056_v38, %v908_v44  ;;  %v2117_v45 = vld [vmem:[#allocation8 + $0x8] sm:$0xff] }
 0x1d3   : > { %v904_v51 = vsel %vm472_vm4, 0.0, %v903_v42  ;;  %v1061_v52 = vperm.slane %v1057_v50, %v1978_v40  ;;  %v557_v29 = vsub.f32 0.0, %v2100_v27  ;;  %v687_v36 = vrot.slane %v1973_v33, 4 }
 0x1d4   : > { %v1046_v54 = vsel %vm472_vm4, %v1045_v47, %v904_v51  ;;  %v1064_v55 = vrot.slane %v1044_v46, 4  ;;  %v1076_v56 = vrot.slane %v1055_v48, 4 }
 0x1d5   : > { %v1050_v57 = vperm.slane %v1046_v54, %v1978_v40  ;;  %v1074_v58 = vrot.slane %v1061_v52, 4  ;;  %568 = vrot.lane.b32.xlu2 %v552_v53, %s1801_s17 }
 0x1d6   : > { %v1077_v59 = vsel %vm472_vm4, %v1061_v52, %v1076_v56 }
 0x1d7   : > { %v1062_v0 = vrot.slane %v1050_v57, 4  ;;  %v1065_v1 = vsel %vm472_vm4, %v1050_v57, %v1064_v55  ;;  %v1075_v2 = vsel %vm472_vm4, %v1074_v58, %v1055_v48  ;;  %v1085_v3 = vperm.slane %v1077_v59, %v1981_v49 }
 0x1d8   : > { %v1073_v4 = vperm.slane %v1065_v1, %v1981_v49  ;;  %v1081_v5 = vperm.slane %v1075_v2, %v1981_v49  ;;  %602 = vrot.lane.b32.xlu1 %v2055_v60, %s1800_s10 }
 0x1d9   : > { %v1063_v6 = vsel %vm472_vm4, %v1062_v0, %v1044_v46  ;;  %v1090_v7 = vrot.slane %v1085_v3, 4  ;;  %572 = vrot.lane.b32.xlu0 %v554_v61, %s1801_s17  ;;  %v2119_v46 = vld [vmem:[#allocation8] sm:$0xff] }
 0x1da   : > { %v1069_v8 = vperm.slane %v1063_v6, %v1981_v49  ;;  %v1086_v9 = vrot.slane %v1081_v5, 4  ;;  %v1092_v10 = vrot.slane %v1073_v4, 4  ;;  %v449_v55 = vrot.slane %v2119_v46, 6 }
 0x1db   : > { %v1091_v12 = vsel %vm472_vm4, %v1090_v7, %v1073_v4 }
 0x1dc   : > { %v1087_v15 = vsel %vm472_vm4, %v1086_v9, %v1069_v8  ;;  %v1088_v16 = vrot.slane %v1069_v8, 4  ;;  %v1093_v17 = vsel %vm472_vm4, %v1085_v3, %v1092_v10  ;;  %v1096_v18 = vpack.c.bf16 %v1091_v12, %v1091_v12 }
 0x1dd   : > { %v1094_v19 = vpack.c.bf16 %v1087_v15, %v1087_v15  ;;  %v1097_v20 = vpack.c.bf16 %v1093_v17, %v1093_v17  ;;  %576 = vrot.lane.b32.xlu2 %v556_v13, %s1801_s17  ;;  %v447_v12 = vrot.slane %v2119_v46, 4  ;;  %v457_v13 = vrot.slane %v2117_v45, 4 }
 0x1de   : > { %v1089_v22 = vsel %vm472_vm4, %v1081_v5, %v1088_v16  ;;  %1100 = vst.msk [vmem:[%s2083_s8 + $0x8] sm:$0xf] %vm971_vm5, %v1096_v18  ;;  %v2142_v5 = vperm.slane %v449_v55, 0 }
 0x1df   : > { %v1095_v24 = vpack.c.bf16 %v1089_v22, %v1089_v22  ;;  %1098 = vst.msk [vmem:[%s2083_s8] sm:$0xf] %vm971_vm5, %v1094_v19  ;;  %v2160_v22 = vperm.slane %v457_v13, 0 }
 0x1e0   : > { %574 = vrot.lane.b32.xlu1 %v555_v23, %s1801_s17  ;;  %1101 = vst.msk [vmem:[%s2083_s8 + $0xc] sm:$0xf] %vm971_vm5, %v1097_v20  ;;  %v550_v16 = vmul.f32 %v2142_v5, %v1994_v63  ;;  %v2158_v20 = vperm.slane %v447_v12, 0 }
 0x1e1   : > { %606 = vrot.lane.b32.xlu0 %v2075_v14, %s1800_s10  ;;  %1099 = vst.msk [vmem:[%s2083_s8 + $0x4] sm:$0xf] %vm971_vm5, %v1095_v24 }
 0x1e5   : > { %582 = vrot.lane.b32.xlu2 %v559_v25, %s1801_s17 }
 0x1e9   : > { %610 = vrot.lane.b32.xlu0 %v2100_v27, %s1800_s10 }
 0x1ed   : > { %570 = vrot.lane.b32.xlu2 %v553_v28, %s1801_s17 }
 0x1f1   : > { %578 = vrot.lane.b32.xlu0 %v557_v29, %s1801_s17  ;;  %v548_v29 = vmul.f32 %v2158_v20, %v2028_v31 }
 0x211   : > { %v676_v30 = vpop.permute.xlu2 %675 }
 0x212   : > { %v699_v43 = vrot.slane %v676_v30, 4 }
 0x21f   : > { %v613_v32 = vpop.permute.xlu2 %612 }
 0x227   : > { %v2108_v34 = vpop.permute.xlu2 %604 }
 0x22a   : > { %v678_v35 = vpop.permute.xlu1 %677 }
 0x22b   : > { %v685_v37 = vrot.slane %v678_v35, 4  ;;  %v688_v38 = vsel %vm472_vm4, %v678_v35, %v687_v36  ;;  %v445_v35 = vrot.slane %v2119_v46, 2  ;;  %v455_v36 = vrot.slane %v2117_v45, 2 }
 0x22c   : > { %v696_v42 = vperm.slane %v688_v38, %v1978_v40 }
 0x22d   : > { %v686_v41 = vsel %vm472_vm4, %v685_v37, %v1973_v33  ;;  %v459_v33 = vrot.slane %v2117_v45, 6 }
 0x22e   : > { %v692_v47 = vperm.slane %v686_v41, %v1978_v40  ;;  %v723_v52 = vrot.slane %v696_v42, 4 }
 0x22f   : > { %v2115_v44 = vpop.permute.xlu2 %568  ;;  %v2132_v62 = vperm.slane %v459_v33, 0 }
 0x230   : > { %v711_v56 = vrot.slane %v692_v47, 4 }
 0x232   : > { %v680_v48 = vpop.permute.xlu1 %679 }
 0x233   : > { %v697_v50 = vrot.slane %v680_v48, 4  ;;  %v700_v51 = vsel %vm472_vm4, %v680_v48, %v699_v43 }
 0x234   : > { %v708_v53 = vperm.slane %v700_v51, %v1978_v40  ;;  %v2188_v51 = vperm.slane %v445_v35, 0 }
 0x235   : > { %v698_v54 = vsel %vm472_vm4, %v697_v50, %v676_v30  ;;  %v528_v50 = vperm.slane %v2119_v46, 0 }
 0x236   : > { %v704_v57 = vperm.slane %v698_v54, %v1978_v40  ;;  %v721_v58 = vrot.slane %v708_v53, 4  ;;  %v724_v59 = vsel %vm472_vm4, %v708_v53, %v723_v52  ;;  %v2190_v52 = vperm.slane %v455_v36, 0 }
 0x237   : > { %v2130_v61 = vperm.slane %v724_v59, %v1981_v49  ;;  %v577_v7 = vpop.permute.xlu2 %576  ;;  %v446_v59 = vrot.slane %v2119_v46, 3 }
 0x238   : > { %v712_v0 = vsel %vm472_vm4, %v704_v57, %v711_v56  ;;  %v709_v3 = vrot.slane %v704_v57, 4  ;;  %v722_v4 = vsel %vm472_vm4, %v721_v58, %v696_v42  ;;  %v633_v42 = vperm.slane %v2117_v45, 0 }
 0x239   : > { %809 = vrot.lane.b32.xlu1 %v2130_v61, %s1800_s10  ;;  %v2138_v1 = vperm.slane %v712_v0, %v1981_v49  ;;  %v755_v2 = vsub.f32 0.0, %v2130_v61  ;;  %v2152_v15 = vperm.slane %v722_v4, %v1981_v49  ;;  %v739_v38 = vrot.slane %v2130_v61, 4 }
 0x23a   : > { %v581_v6 = vpop.permute.xlu1 %580  ;;  %v710_v17 = vsel %vm472_vm4, %v709_v3, %v692_v47  ;;  %v454_v56 = vrot.slane %v2117_v45, 1  ;;  %v444_v58 = vrot.slane %v2119_v46, 1  ;;  %v546_v3 = vmul.f32 %v2188_v51, %v2016_v21 }
 0x23b   : > { %v631_v8 = vsel %vm624_vm6, %v581_v6, %v613_v32  ;;  %801 = vrot.lane.b32.xlu2 %v2138_v1, %s1800_s10  ;;  %777 = vrot.lane.b32.xlu0 %v755_v2, %s1801_s17  ;;  %v601_v9 = vpop.permute.xlu0 %600  ;;  %v751_v18 = vsub.f32 0.0, %v2138_v1  ;;  %v2164_v23 = vperm.slane %v710_v17, %v1981_v49  ;;  %v753_v24 = vsub.f32 0.0, %v2152_v15 }
 0x23c   : > { %v655_v10 = vmul.f32 %v2132_v62, %v631_v8  ;;  %v735_v41 = vrot.slane %v2138_v1, 4  ;;  %v625_v31 = vsel %vm624_vm6, %v2115_v44, %v601_v9  ;;  %v2196_v54 = vsel %vm472_vm4, 0.0, %v739_v38 }
 0x23d   : > { %v749_v43 = vsub.f32 0.0, %v2164_v23  ;;  %v649_v44 = vmul.f32 %v633_v42, %v625_v31  ;;  %v544_v2 = vmul.f32 %v528_v50, %v2004_v11  ;;  %v456_v6 = vrot.slane %v2117_v45, 3 }
 0x23e   : > { %v663_v19 = vadd.f32 %v655_v10, %v550_v16  ;;  %v2199_v55 = vsel %vm472_vm4, 0.0, %v735_v41  ;;  %v2220_v10 = vperm.slane %v454_v56, 0  ;;  %v2223_v13 = vperm.slane %v444_v58, 0 }
 0x23f   : > { %v2176_v32 = vpop.permute.xlu2 %582  ;;  %v657_v8 = vadd.f32 %v649_v44, %v544_v2  ;;  %v737_v16 = vrot.slane %v2152_v15, 4  ;;  %v2227_v21 = vperm.slane %v446_v59, 0  ;;  %v460_v38 = vrot.slane %v2117_v45, 7 }
 0x240   : > { %v671_v28 = vmul.f32 0.25, %v663_v19  ;;  %v2231_v19 = vperm.slane %v456_v6, 0  ;;  %v545_v35 = vmul.f32 %v2223_v13, %v2055_v60  ;;  %v450_v31 = vrot.slane %v2119_v46, 7 }
 0x241   : > { %769 = vrot.lane.b32.xlu1 %v751_v18, %s1801_s17  ;;  %v752_v18 = vsub.f32 0.0, %v2199_v55  ;;  %v2253_v44 = vperm.slane %v460_v38, 0 }
 0x242   : > { %v609_v25 = vpop.permute.xlu1 %608  ;;  %v923_v47 = vrot.slane %v671_v28, 4  ;;  %v2261_v59 = vperm.slane %v450_v31, 0 }
 0x243   : > { %v629_v26 = vsel %vm624_vm6, %v577_v7, %v609_v25  ;;  %797 = vrot.lane.b32.xlu2 %v2164_v23, %s1800_s10  ;;  %773 = vrot.lane.b32.xlu0 %v753_v24, %s1801_s17  ;;  %v2171_v63 = vpop.permute.xlu0 %614  ;;  %v733_v7 = vrot.slane %v2164_v23, 4  ;;  %v665_v25 = vmul.f32 0.25, %v657_v8  ;;  %v458_v8 = vrot.slane %v2117_v45, 5 }
 0x244   : > { %v653_v30 = vmul.f32 %v2160_v22, %v629_v26  ;;  %v632_v58 = vsel %vm624_vm6, %v2176_v32, %v2171_v63  ;;  %v551_v32 = vmul.f32 %v2261_v59, %v2036_v39 }
 0x245   : > { %v2234_v24 = vsel %vm472_vm4, 0.0, %v733_v7  ;;  %v656_v6 = vmul.f32 %v2253_v44, %v632_v58 }
 0x246   : > { %v661_v37 = vadd.f32 %v653_v30, %v548_v29 }
 0x247   : > { %v571_v9 = vpop.permute.xlu2 %570 }
 0x248   : > { %v669_v48 = vmul.f32 0.25, %v661_v37  ;;  %v2244_v37 = vsel %vm472_vm4, 0.0, %v737_v16  ;;  %v664_v16 = vadd.f32 %v656_v6, %v551_v32 }
 0x249   : > { %765 = vrot.lane.b32.xlu1 %v749_v43, %s1801_s17  ;;  %v547_v43 = vmul.f32 %v2227_v21, %v2075_v14  ;;  %v754_v60 = vsub.f32 0.0, %v2244_v37 }
 0x24a   : > { %v2193_v53 = vsel %vm472_vm4, %v923_v47, %v669_v48  ;;  %v603_v33 = vpop.permute.xlu1 %602 }
 0x24b   : > { %811 = vrot.lane.b32.xlu2 %v2196_v54, %s1800_s10  ;;  %803 = vrot.lane.b32.xlu0 %v2199_v55, %s1800_s10  ;;  %v573_v57 = vpop.permute.xlu0 %572  ;;  %v626_v11 = vsel %vm624_vm6, %v571_v9, %v603_v33 }
 0x24c   : > { %v627_v0 = vsel %vm624_vm6, %v573_v57, %v2108_v34  ;;  %v756_v34 = vsub.f32 0.0, %v2196_v54  ;;  %v650_v26 = vmul.f32 %v2220_v10, %v626_v11  ;;  %v750_v57 = vsub.f32 0.0, %v2234_v24 }
 0x24d   : > { %v651_v4 = vmul.f32 %v2190_v52, %v627_v0 }
 0x24e   : > { %v658_v48 = vadd.f32 %v650_v26, %v545_v35  ;;  %v928_v35 = vperm.slane %v2193_v53, %v1978_v40 }
 0x24f   : > { %v659_v12 = vadd.f32 %v651_v4, %v546_v3  ;;  %v448_v4 = vrot.slane %v2119_v46, 5 }
 0x250   : > { %v666_v0 = vmul.f32 0.25, %v658_v48 }
 0x251   : > { %v667_v17 = vmul.f32 0.25, %v659_v12  ;;  %779 = vrot.lane.b32.xlu1 %v756_v34, %s1801_s17  ;;  %v2272_v11 = vperm.slane %v448_v4, 0 }
 0x252   : > { %v575_v29 = vpop.permute.xlu1 %574 }
 0x253   : > { %v911_v28 = vrot.slane %v667_v17, 4  ;;  %771 = vrot.lane.b32.xlu2 %v752_v18, %s1801_s17  ;;  %799 = vrot.lane.b32.xlu0 %v2234_v24, %s1800_s10  ;;  %v607_v30 = vpop.permute.xlu0 %606  ;;  %v2276_v17 = vperm.slane %v458_v8, 0  ;;  %v549_v26 = vmul.f32 %v2272_v11, %v2100_v27 }
 0x254   : > { %v628_v36 = vsel %vm624_vm6, %v575_v29, %v607_v30 }
 0x255   : > { %v912_v41 = vsel %vm472_vm4, %v911_v28, %v665_v25  ;;  %v652_v47 = vmul.f32 %v2231_v19, %v628_v36  ;;  %v672_v28 = vmul.f32 0.25, %v664_v16 }
 0x256   : > { %v916_v14 = vperm.slane %v912_v41, %v1978_v40 }
 0x257   : > { %v660_v33 = vadd.f32 %v652_v47, %v547_v43  ;;  %v929_v36 = vrot.slane %v672_v28, 4  ;;  %v949_v47 = vrot.slane %v928_v35, 4 }
 0x258   : > { %v937_v9 = vrot.slane %v916_v14, 4 }
 0x259   : > { %v668_v56 = vmul.f32 0.25, %v660_v33  ;;  %775 = vrot.lane.b32.xlu1 %v754_v60, %s1801_s17 }
 0x25b   : > { %v917_v2 = vrot.slane %v668_v56, 4  ;;  %767 = vrot.lane.b32.xlu2 %v750_v57, %s1801_s17  ;;  %v611_v3 = vpop.permute.xlu0 %610 }
 0x25d   : > { %v918_v7 = vsel %vm472_vm4, %v917_v2, %v666_v0 }
 0x25e   : > { %v922_v63 = vperm.slane %v918_v7, %v1978_v40 }
 0x260   : > { %v935_v12 = vrot.slane %v922_v63, 4  ;;  %v938_v34 = vsel %vm472_vm4, %v922_v63, %v937_v9 }
 0x261   : > { %805 = vrot.lane.b32.xlu1 %v2152_v15, %s1800_s10  ;;  %v946_v41 = vperm.slane %v938_v34, %v1981_v49 }
 0x262   : > { %v936_v18 = vsel %vm472_vm4, %v935_v12, %v916_v14 }
 0x263   : > { %807 = vrot.lane.b32.xlu2 %v2244_v37, %s1800_s10  ;;  %v579_v25 = vpop.permute.xlu0 %578  ;;  %v942_v48 = vperm.slane %v936_v18, %v1981_v49  ;;  %v965_v60 = vrot.slane %v946_v41, 4 }
 0x264   : > { %v630_v39 = vsel %vm624_vm6, %v579_v25, %v611_v3 }
 0x265   : > { %v654_v29 = vmul.f32 %v2276_v17, %v630_v39  ;;  %v961_v57 = vrot.slane %v942_v48, 4 }
 0x267   : > { %v662_v30 = vadd.f32 %v654_v29, %v549_v26 }
 0x269   : > { %v670_v38 = vmul.f32 0.25, %v662_v30 }
 0x26b   : > { %v930_v43 = vsel %vm472_vm4, %v929_v36, %v670_v38 }
 0x26c   : > { %v934_v31 = vperm.slane %v930_v43, %v1978_v40 }
 0x26e   : > { %v947_v27 = vrot.slane %v934_v31, 4  ;;  %v950_v33 = vsel %vm472_vm4, %v934_v31, %v949_v47 }
 0x26f   : > { %v958_v53 = vperm.slane %v950_v33, %v1981_v49 }
 0x270   : > { %v948_v56 = vsel %vm472_vm4, %v947_v27, %v928_v35 }
 0x271   : > { %v954_v58 = vperm.slane %v948_v56, %v1981_v49  ;;  %v963_v14 = vrot.slane %v958_v53, 4  ;;  %v966_v0 = vsel %vm472_vm4, %v958_v53, %v965_v60 }
 0x272   : > { %v970_v2 = vpack.c.bf16 %v966_v0, %v966_v0 }
 0x273   : > { %v959_v3 = vrot.slane %v954_v58, 4  ;;  %v962_v4 = vsel %vm472_vm4, %v954_v58, %v961_v57  ;;  %v964_v6 = vsel %vm472_vm4, %v963_v14, %v946_v41 }
 0x274   : > { %v968_v7 = vpack.c.bf16 %v962_v4, %v962_v4  ;;  %v969_v8 = vpack.c.bf16 %v964_v6, %v964_v6  ;;  %975 = vst.msk [vmem:[%s348_s24 + $0xc] sm:$0xf] %vm971_vm5, %v970_v2 }
 0x275   : > { %v960_v9 = vsel %vm472_vm4, %v959_v3, %v942_v48 }
 0x276   : > { %v967_v63 = vpack.c.bf16 %v960_v9, %v960_v9  ;;  %973 = vst.msk [vmem:[%s348_s24 + $0x4] sm:$0xf] %vm971_vm5, %v968_v7 }
 0x277   : > { %974 = vst.msk [vmem:[%s348_s24 + $0x8] sm:$0xf] %vm971_vm5, %v969_v8 }
 0x278   : > { %972 = vst.msk [vmem:[%s348_s24] sm:$0xf] %vm971_vm5, %v967_v63 }
 0x279   : > { %1664 = shalt.err (!%p1661_p0)
}
 0x27a   : > { %s1802_s9 = smov 4   ;;  %v743_v30 = vmul.f32 %v2138_v1, %v2188_v51  ;;  %v741_v41 = vmul.f32 %v2164_v23, %v528_v50  ;;  %v744_v51 = vmul.f32 %v2199_v55, %v2227_v21  ;;  %v747_v63 = vmul.f32 %v2130_v61, %v2142_v5  ;;  %s1161_s29 = scalar_lea.hbm %s2471_s6, %s2292_s11 }
 0x27b   : > { %1414 = dma.vmem_to_hbm [thread:$0]  (%p1925_p3), %s1127_s19, 256, %s1129_s20, %s1103_s2, %s1794_s1, %s1794_s1, %s1802_s9  }
 0x27c   : > { %s1143_s20 = scalar_lea.hbm %s2470_s5, %s2292_s11  ;;  %s1107_s10 = sand.u32 1, %s1869_s27  }
 0x27d   : > { %s355_s17 = scalar_lea.vmem [#allocation11], %s2067_s16  ;;  %s2391_s14 = sshll.u32 %s1143_s20, 4  ;;  %s1147_s14 = int_to_ptr.hbm [resolvable:$true] %s2391_s14 }
 0x27e   : > { %s1144_s13 = sshll.u32 %s355_s17, 4  ;;  %s2394_s18 = sshll.u32 %s1161_s29, 4  ;;  %s1145_s13 = int_to_ptr.vmem [resolvable:$true] %s1144_s13  ;;  %s1165_s18 = int_to_ptr.hbm [resolvable:$true] %s2394_s18 }
 0x27f   : > { %s1162_s11 = sshll.u32 %s2083_s8, 4  ;;  %s2405_s27 = scalar_lea.sflag [#allocation12], %s1107_s10  ;;  %s2401_s11 = int_to_ptr.vmem [resolvable:$true] %s1162_s11 }
 0x280   : > { %s1679_s16 = sshra.s32 %s1147_s14, 4  ;;  %s1685_s20 = scalar_lea.hbm %s2470_s5, 32  ;;  %s1680_s16 = int_to_ptr.hbm [resolvable:$true] %s1679_s16 }
 0x281   : > { %s1681_s24 = scalar_lea.hbm %s1680_s16, 16  ;;  %p1686_p2 = scmp.lt.s32.totalorder %s1680_s16, %s2470_s5 }
 0x282   : > { %p1682_p5 = scmp.ne.s32.totalorder %s1680_s16, %s1681_s24  ;;  %p1687_p1 = scmp.lt.s32.totalorder %s1685_s20, %s1681_s24 }
 0x284   : > { %p1683_p7 = pnand %p1682_p5, %p1925_p3  ;;  %p1688_p4 = por %p1687_p1, %p1686_p2 }
 0x286   : > { %p1684_p10 = pneg %p1683_p7 }
 0x288   : > { %p1689_p8 = pnand %p1688_p4, %p1684_p10 }
 0x295   : > { %v802_v32 = vpop.permute.xlu2 %801 }
 0x29d   : > { %v798_v12 = vpop.permute.xlu2 %797 }
 0x2a5   : > { %v812_v16 = vpop.permute.xlu2 %811 }
 0x2ab   : > { %v810_v34 = vpop.permute.xlu1 %809 }
 0x2ad   : > { %v778_v18 = vpop.permute.xlu0 %777  ;;  %v772_v28 = vpop.permute.xlu2 %771 }
 0x2ae   : > { %v827_v3 = vsel %vm624_vm6, %v778_v18, %v810_v34 }
 0x2af   : > { %v835_v6 = vmul.f32 %v827_v3, %v2132_v62 }
 0x2b3   : > { %v770_v25 = vpop.permute.xlu1 %769 }
 0x2b4   : > { %v823_v39 = vsel %vm624_vm6, %v770_v25, %v802_v32 }
 0x2b5   : > { %v774_v26 = vpop.permute.xlu0 %773  ;;  %v831_v29 = vmul.f32 %v823_v39, %v2190_v52  ;;  %v768_v52 = vpop.permute.xlu2 %767 }
 0x2b7   : > { %v839_v35 = vadd.f32 %v831_v29, %v743_v30 }
 0x2b9   : > { %v976_v48 = vrot.slane %v839_v35, 4 }
 0x2bb   : > { %v766_v36 = vpop.permute.xlu1 %765 }
 0x2bc   : > { %v821_v38 = vsel %vm624_vm6, %v766_v36, %v798_v12  ;;  %v843_v12 = vadd.f32 %v835_v6, %v747_v63 }
 0x2bd   : > { %v829_v43 = vmul.f32 %v821_v38, %v633_v42  ;;  %v804_v47 = vpop.permute.xlu0 %803  ;;  %v742_v42 = vmul.f32 %v2234_v24, %v2223_v13  ;;  %v808_v58 = vpop.permute.xlu2 %807 }
 0x2be   : > { %v824_v31 = vsel %vm624_vm6, %v772_v28, %v804_v47 }
 0x2bf   : > { %v837_v27 = vadd.f32 %v829_v43, %v741_v41  ;;  %v832_v1 = vmul.f32 %v824_v31, %v2231_v19  ;;  %v748_v19 = vmul.f32 %v2196_v54, %v2261_v59 }
 0x2c1   : > { %v977_v33 = vsel %vm472_vm4, %v976_v48, %v837_v27  ;;  %v840_v23 = vadd.f32 %v832_v1, %v744_v51 }
 0x2c2   : > { %v981_v57 = vperm.slane %v977_v33, %v1978_v40 }
 0x2c3   : > { %v780_v60 = vpop.permute.xlu1 %779  ;;  %v982_v55 = vrot.slane %v840_v23, 4 }
 0x2c4   : > { %v828_v46 = vsel %vm624_vm6, %v780_v60, %v812_v16  ;;  %v1002_v4 = vrot.slane %v981_v57, 4  ;;  %v988_v16 = vrot.slane %v843_v12, 4 }
 0x2c5   : > { %v800_v50 = vpop.permute.xlu0 %799  ;;  %v836_v53 = vmul.f32 %v828_v46, %v2253_v44 }
 0x2c6   : > { %v822_v45 = vsel %vm624_vm6, %v768_v52, %v800_v50 }
 0x2c7   : > { %v830_v56 = vmul.f32 %v822_v45, %v2220_v10  ;;  %v844_v14 = vadd.f32 %v836_v53, %v748_v19  ;;  %v746_v10 = vmul.f32 %v2244_v37, %v2272_v11  ;;  %v745_v11 = vmul.f32 %v2152_v15, %v2158_v20 }
 0x2c9   : > { %v838_v21 = vadd.f32 %v830_v56, %v742_v42  ;;  %v994_v7 = vrot.slane %v844_v14, 4 }
 0x2cb   : > { %v983_v0 = vsel %vm472_vm4, %v982_v55, %v838_v21  ;;  %v776_v2 = vpop.permute.xlu1 %775 }
 0x2cc   : > { %v987_v13 = vperm.slane %v983_v0, %v1978_v40  ;;  %v826_v24 = vsel %vm624_vm6, %v776_v2, %v808_v58 }
 0x2cd   : > { %v834_v44 = vmul.f32 %v826_v24, %v2276_v17 }
 0x2ce   : > { %v1000_v54 = vrot.slane %v987_v13, 4  ;;  %v1003_v59 = vsel %vm472_vm4, %v987_v13, %v1002_v4 }
 0x2cf   : > { %v842_v8 = vadd.f32 %v834_v44, %v746_v10 }
 0x2d0   : > { %v1001_v9 = vsel %vm472_vm4, %v1000_v54, %v981_v57 }
 0x2d1   : > { %v995_v32 = vsel %vm472_vm4, %v994_v7, %v842_v8  ;;  %v1007_v25 = vperm.slane %v1001_v9, %v1981_v49 }
 0x2d2   : > { %v999_v62 = vperm.slane %v995_v32, %v1978_v40 }
 0x2d3   : > { %v806_v34 = vpop.permute.xlu1 %805  ;;  %v1026_v20 = vrot.slane %v1007_v25, 4 }
 0x2d4   : > { %v825_v37 = vsel %vm624_vm6, %v774_v26, %v806_v34  ;;  %v1012_v5 = vrot.slane %v999_v62, 4  ;;  %v1011_v26 = vperm.slane %v1003_v59, %v1981_v49 }
 0x2d5   : > { %v833_v17 = vmul.f32 %v825_v37, %v2160_v22 }
 0x2d6   : > { %v1030_v30 = vrot.slane %v1011_v26, 4 }
 0x2d7   : > { %v841_v18 = vadd.f32 %v833_v17, %v745_v11 }
 0x2d9   : > { %v989_v61 = vsel %vm472_vm4, %v988_v16, %v841_v18 }
 0x2da   : > { %v993_v39 = vperm.slane %v989_v61, %v1978_v40 }
 0x2dc   : > { %v1013_v28 = vsel %vm472_vm4, %v1012_v5, %v993_v39  ;;  %v1014_v15 = vrot.slane %v993_v39, 4 }
 0x2dd   : > { %v1019_v22 = vperm.slane %v1013_v28, %v1981_v49 }
 0x2de   : > { %v1015_v29 = vsel %vm472_vm4, %v999_v62, %v1014_v15 }
 0x2df   : > { %v1023_v35 = vperm.slane %v1015_v29, %v1981_v49  ;;  %v1024_v40 = vrot.slane %v1019_v22, 4  ;;  %v1027_v36 = vsel %vm472_vm4, %v1019_v22, %v1026_v20 }
 0x2e0   : > { %v1033_v38 = vpack.c.bf16 %v1027_v36, %v1027_v36 }
 0x2e1   : > { %v1025_v41 = vsel %vm472_vm4, %v1024_v40, %v1007_v25  ;;  %v1028_v43 = vrot.slane %v1023_v35, 4  ;;  %v1031_v47 = vsel %vm472_vm4, %v1023_v35, %v1030_v30 }
 0x2e2   : > { %v1032_v49 = vpack.c.bf16 %v1025_v41, %v1025_v41  ;;  %v1035_v31 = vpack.c.bf16 %v1031_v47, %v1031_v47  ;;  %1037 = vst.msk [vmem:[%s355_s17 + $0x4] sm:$0xf] %vm971_vm5, %v1033_v38 }
 0x2e3   : > { %v1029_v48 = vsel %vm472_vm4, %v1028_v43, %v1011_v26 }
 0x2e4   : > { %v1034_v27 = vpack.c.bf16 %v1029_v48, %v1029_v48  ;;  %1036 = vst.msk [vmem:[%s355_s17] sm:$0xf] %vm971_vm5, %v1032_v49 }
 0x2e5   : > { %1039 = vst.msk [vmem:[%s355_s17 + $0xc] sm:$0xf] %vm971_vm5, %v1035_v31 }
 0x2e6   : > { %1038 = vst.msk [vmem:[%s355_s17 + $0x8] sm:$0xf] %vm971_vm5, %v1034_v27 }
 0x2e7   : > { %1692 = shalt.err (!%p1689_p8)
}
 0x2e8   : > { %1415 = dma.vmem_to_hbm [thread:$0]  (%p1925_p3), %s1145_s13, 256, %s1147_s14, %s2405_s27, %s1794_s1, %s1794_s1, %s1802_s9  }
 0x2e9   : > { %s1707_s29 = sshra.s32 %s1165_s18, 4  ;;  %s1713_s24 = scalar_lea.hbm %s2471_s6, 32  ;;  %s1708_s29 = int_to_ptr.hbm [resolvable:$true] %s1707_s29 }
 0x2ea   : > { %s1709_s10 = scalar_lea.hbm %s1708_s29, 16  ;;  %p1714_p0 = scmp.lt.s32.totalorder %s1708_s29, %s2471_s6 }
 0x2eb   : > { %p1710_p11 = scmp.ne.s32.totalorder %s1708_s29, %s1709_s10  ;;  %p1715_p5 = scmp.lt.s32.totalorder %s1713_s24, %s1709_s10 }
 0x2ed   : > { %p1711_p12 = pnand %p1710_p11, %p1925_p3  ;;  %p1716_p7 = por %p1715_p5, %p1714_p0 }
 0x2ef   : > { %p1712_p13 = pneg %p1711_p12 }
 0x2f1   : > { %p1717_p10 = pnand %p1716_p7, %p1712_p13 }
 0x2f3   : > { %1720 = shalt.err (!%p1717_p10)
}
 0x2f4   : > { %1416 = dma.vmem_to_hbm [thread:$0]  (%p1925_p3), %s2401_s11, 256, %s1165_s18, %s2405_s27, %s1794_s1, %s1794_s1, %s1802_s9  }
 0x2f5 PF: > { %s1179_s13 = sand.u32 1, %s1767_s21   ;;  %p1435_p2 = pnand %p1353_p9, %p1885_p6 }
 0x2f6   : > { %s1180_s14 = scalar_lea.sflag [#allocation4], %s1179_s13 }
 0x2f7   : > { %p1436_p1 = pneg %p1435_p2 }
 0x2f9   : > { %1758 = dma.done.wait (%p1436_p1), %s1180_s14, 256  }
 0x2fa   : > { %1760 = vsyncadd (%p1436_p1), %s1180_s14, 4294967040  ;;  %s2483_s15 = sadd.s32 4294967294, %s1787_s26  }
 0x2fb   : > { %s1189_s20 = sand.u32 1, %s2483_s15  }
 0x2fc   : > { %s1190_s2 = scalar_lea.sflag [#allocation12], %s1189_s20 }
 0x2fd   : > { %1762 = dma.done.wait (%p1436_p1), %s1190_s2, 512  }
 0x2fe   : > { %1764 = vsyncadd (%p1436_p1), %s1190_s2, 4294966784  ;;  %s28_s26 = sadd.s32 1, %s1787_s26   ;;  %s2484_s21 = smov %s1771_s22 }
 0x2ff   : > { %p25_p3 = scmp.ge.s32.totalorder %s28_s26, 4   ;;  %s2485_s22 = smov %s1775_s23 }
 0x300   : > { %s2486_s23 = smov %s1941_s7  ;;  %s2487_s24 = smov %s1783_s25 }
 0x301   : > { %s2488_s25 = smov %s2490_s12  ;;  %27 = sbr.rel (!%p25_p3) target bundleno = 13 (0xd), region = 127 }
 0x306   :  { %1206 = vsyncpa [#allocation3], 1 }
 0x307   :  { %1208 = vsyncpa [#allocation3 + $0x1], 1 }
 0x308   :  { %1209 = vsyncpa [#allocation6], 1 }
 0x309   :  { %1210 = vsyncpa [#allocation9], 1 }
 0x30a   :  { %1211 = vsyncpa [#allocation4], 1 }
 0x30b   :  { %1213 = vsyncpa [#allocation4 + $0x1], 1 }
 0x30c   :  { %1214 = vsyncpa [#allocation12], 1 }
 0x30d   :  { %1216 = vsyncpa [#allocation12 + $0x1], 1 }

</bundles_post_ra>
